<compile_context>
chip_gen: v6e
topology: v6e:2x2x1
jax: 0.10.0
libtpu: 0.0.40
codegen_flags: <defaults>
</compile_context>

<pallas_src>
import functools

import numpy as np
import jax
import jax.numpy as jnp
from jax.experimental import pallas as pl
from jax.experimental.pallas import tpu as pltpu

KSIZE = 3  # kernel_size=3 (module default)


# ----------------------------- Pallas kernel --------------------------------
def _polyphase_matmul_kernel(w_ref, x_ref, o_ref):
    # w_ref: (ROWS, K)  bf16 - per-(phase, cout) weight rows (1/3 scale + bias column folded in)
    # x_ref: (K, TM)    bf16 - polyphase patch columns (+ trailing ones row for the bias)
    # o_ref: (ROWS, TM) f32  - lane-dense output tile
    o_ref[...] = jnp.dot(w_ref[...], x_ref[...], preferred_element_type=jnp.float32)


# --------------------------- polyphase machinery ------------------------------
def _phase_shift_selectors(stride, padding, ksize):
    """Per spatial dim: output o = stride*m + r receives x[m + delta] * w[k] whenever
    o = i*stride - padding + k with i = m + delta.  Returns (S, dmin, n_shift) where
    S[r, j, k] = 1 iff tap k is used for phase r at shift index j = delta - dmin."""
    pairs = []
    for r in range(stride):
        for k in range(ksize):
            if (r + padding - k) % stride == 0:
                pairs.append((r, (r + padding - k) // stride, k))
    deltas = [d for _, d, _ in pairs]
    dmin, dmax = min(deltas), max(deltas)
    n_shift = dmax - dmin + 1
    sel = np.zeros((stride, n_shift, ksize), np.float32)
    for r, d, k in pairs:
        sel[r, d - dmin, k] = 1.0
    return sel, dmin, n_shift


def _build_weight_matrix(ws, bs, scale, stride, padding):
    """ws: list of (Cin, Cout, K, K, K) transposed-conv weights (one per branch).
    Returns (ROWS, Kdim): ROWS = stride^3*Cout rows ordered (rd, rh, rw, cout);
    Kdim = n_shift^3*B*Cin + 1 columns ordered (jd, jh, jw, branch, cin) plus a bias column."""
    sel, _, n_sh = _phase_shift_selectors(stride, padding, KSIZE)
    S = jnp.asarray(sel)
    cin, cout = ws[0].shape[0], ws[0].shape[1]
    picked = [jnp.einsum("apk,bql,crm,ioklm->abcpqrio", S, S, S, w) for w in ws]
    wb = jnp.stack(picked, axis=0)                          # (B, rd,rh,rw, jd,jh,jw, ci, co)
    wb = jnp.transpose(wb, (1, 2, 3, 8, 4, 5, 6, 0, 7))     # (rd,rh,rw, co, jd,jh,jw, B, ci)
    wmat = wb.reshape(stride ** 3 * cout, n_sh ** 3 * len(ws) * cin) * scale
    bias_col = jnp.tile(sum(bs) * scale, stride ** 3).reshape(-1, 1)
    return jnp.concatenate([wmat, bias_col], axis=1)        # (ROWS, Kdim)


def _build_patch_matrix(xsel, stride, padding, out_sizes):
    """xsel: (B, Cin, T_out, N, D, H, W) -> ((Kdim, M) bf16 patch matrix with ones row, M)."""
    B, Cin, T_out, N, D, H, W = xsel.shape
    _, dmin, n_sh = _phase_shift_selectors(stride, padding, KSIZE)
    Do, Ho, Wo = out_sizes
    Qd, Qh, Qw = Do // stride, Ho // stride, Wo // stride
    dmax = dmin + n_sh - 1
    pad_lo = max(0, -dmin)
    off0 = pad_lo + dmin
    pads = [(pad_lo, max(0, Q + dmax - dim)) for dim, Q in ((D, Qd), (H, Qh), (W, Qw))]
    xpad = jnp.pad(xsel.astype(jnp.bfloat16),
                   ((0, 0), (0, 0), (0, 0), (0, 0), pads[0], pads[1], pads[2]))
    slabs = []
    for jd in range(n_sh):
        for jh in range(n_sh):
            for jw in range(n_sh):
                slab = xpad[:, :, :, :,
                            off0 + jd: off0 + jd + Qd,
                            off0 + jh: off0 + jh + Qh,
                            off0 + jw: off0 + jw + Qw]
                slabs.append(slab.reshape(B * Cin, -1))
    M = T_out * N * Qd * Qh * Qw
    X = jnp.concatenate(slabs, axis=0)                       # (n_sh^3 * B * Cin, M)
    return jnp.concatenate([X, jnp.ones((1, M), jnp.bfloat16)], axis=0), M


def _conv_branches(xsel, ws, bs, scale, stride, padding, output_padding, max_tile=2048):
    """xsel: (B, Cin, T_out, N, D, H, W) -> (N, Cout, T_out, Do, Ho, Wo)."""
    B, Cin, T_out, N, D, H, W = xsel.shape
    Cout = ws[0].shape[1]
    Do = (D - 1) * stride - 2 * padding + KSIZE + output_padding
    Ho = (H - 1) * stride - 2 * padding + KSIZE + output_padding
    Wo = (W - 1) * stride - 2 * padding + KSIZE + output_padding
    assert Do % stride == 0 and Ho % stride == 0 and Wo % stride == 0, (
        "polyphase path requires the output extent to be a multiple of the stride")

    wmat = _build_weight_matrix(ws, bs, scale, stride, padding).astype(jnp.bfloat16)
    X, M = _build_patch_matrix(xsel, stride, padding, (Do, Ho, Wo))
    ROWS, Kdim = wmat.shape
    assert X.shape[0] == Kdim

    # Pad the contraction dim to a multiple of 8 (clean sublane tiling for the bf16 operands).
    Kpad = ((Kdim + 7) // 8) * 8
    if Kpad != Kdim:
        wmat = jnp.pad(wmat, ((0, 0), (0, Kpad - Kdim)))
        X = jnp.pad(X, ((0, Kpad - Kdim), (0, 0)))
        Kdim = Kpad

    # Lane tile: multiple of 128, large enough to amortize per-step overhead, and (when possible)
    # >= 2 grid steps so both v7x TensorCores get work.  VMEM use per step is < 1 MiB.
    if M <= 256:
        tm = ((M + 127) // 128) * 128
    else:
        tm = min(max_tile, ((pl.cdiv(M, 2) + 127) // 128) * 128)
    grid = pl.cdiv(M, tm)
    Mpad = grid * tm
    if Mpad != M:
        X = jnp.pad(X, ((0, 0), (0, Mpad - M)))

    out_flat = pl.pallas_call(
        _polyphase_matmul_kernel,
        out_shape=jax.ShapeDtypeStruct((ROWS, Mpad), jnp.float32),
        grid=(grid,),
        in_specs=[
            pl.BlockSpec((ROWS, Kdim), lambda i: (0, 0)),   # weights stay resident
            pl.BlockSpec((Kdim, tm), lambda i: (0, i)),     # stream patch columns (lane dim)
        ],
        out_specs=pl.BlockSpec((ROWS, tm), lambda i: (0, i)),
        compiler_params=pltpu.CompilerParams(dimension_semantics=("parallel",)),
    )(wmat, X)

    out = out_flat[:, :M].reshape(stride, stride, stride, Cout, T_out, N,
                                  Do // stride, Ho // stride, Wo // stride)
    # (rd,rh,rw,co,to,n,md,mh,mw) -> (n,co,to,md,rd,mh,rh,mw,rw), then interleave phases.
    out = jnp.transpose(out, (5, 3, 4, 6, 0, 7, 1, 8, 2))
    return out.reshape(N, Cout, T_out, Do, Ho, Wo)


def conv_transpose4d_forward(x, params, stride=2, padding=1, output_padding=1):
    """Faithful port of ConvTranspose4d.forward; x: (N, Cin, T, D, H, W)."""
    N, Cin, T, D, H, W = x.shape
    valid_ts = [t for t in range(0, T, stride) if t + 2 < T]
    if valid_ts:
        tidx = np.asarray([[t, t + 1, t + 2] for t in valid_ts], dtype=np.int32)  # (T_out, 3)
        xsel = x[:, :, tidx]                                    # (N, Cin, T_out, 3, D, H, W)
        xsel = jnp.transpose(xsel, (3, 1, 2, 0, 4, 5, 6))       # (B=3, Cin, T_out, N, D, H, W)
        return _conv_branches(
            xsel,
            [params["w1"], params["w2"], params["w3"]],
            [params["b1"], params["b2"], params["b3"]],
            1.0 / 3.0, stride, padding, output_padding)
    # fallback branch of the PyTorch module: single conv_t1 on t=0, no averaging
    x0 = jnp.transpose(x[:, :, 0], (1, 0, 2, 3, 4))[None, :, None]  # (1, Cin, 1, N, D, H, W)
    return _conv_branches(x0, [params["w1"]], [params["b1"]],
                          1.0, stride, padding, output_padding)


# --------------------------- pure-JAX reference -------------------------------
def _ref_conv_transpose3d(x3, w, b, stride, padding, output_padding):
    wf = jnp.transpose(jnp.flip(w, axis=(2, 3, 4)), (1, 0, 2, 3, 4))  # (Cout, Cin, K, K, K)
    pad = [(KSIZE - 1 - padding, KSIZE - 1 - padding + output_padding)] * 3
    y = jax.lax.conv_general_dilated(
        x3, wf, window_strides=(1, 1, 1), padding=pad,
        lhs_dilation=(stride,) * 3,
        dimension_numbers=("NCDHW", "OIDHW", "NCDHW"))
    return y + b.reshape(1, -1, 1, 1, 1)


def _ref_forward(x, params, stride, padding, output_padding):
    T = x.shape[2]
    outs = []
    for t in range(0, T, stride):
        if t + 2 < T:
            y1 = _ref_conv_transpose3d(x[:, :, t], params["w1"], params["b1"], stride, padding, output_padding)
            y2 = _ref_conv_transpose3d(x[:, :, t + 1], params["w2"], params["b2"], stride, padding, output_padding)
            y3 = _ref_conv_transpose3d(x[:, :, t + 2], params["w3"], params["b3"], stride, padding, output_padding)
            outs.append((y1 + y2 + y3) / 3.0)
    if not outs:
        outs.append(_ref_conv_transpose3d(x[:, :, 0], params["w1"], params["b1"], stride, padding, output_padding))
    return jnp.stack(outs, axis=2)


# --------------------------------- main ---------------------------------------
if __name__ == "__main__":
    key = jax.random.PRNGKey(0)
    k_x, k_w1, k_w2, k_w3, k_b1, k_b2, k_b3 = jax.random.split(key, 7)

    batch, in_ch, out_ch = 2, 4, 4
    T, D, H, W = 8, 8, 8, 8
    stride, padding, output_padding = 2, 1, 1

    x = jax.random.normal(k_x, (batch, in_ch, T, D, H, W), jnp.float32)
    wshape = (in_ch, out_ch, KSIZE, KSIZE, KSIZE)   # PyTorch ConvTranspose3d weight layout
    params = {
        "w1": 0.1 * jax.random.normal(k_w1, wshape, jnp.float32),
        "w2": 0.1 * jax.random.normal(k_w2, wshape, jnp.float32),
        "w3": 0.1 * jax.random.normal(k_w3, wshape, jnp.float32),
        "b1": 0.1 * jax.random.normal(k_b1, (out_ch,), jnp.float32),
        "b2": 0.1 * jax.random.normal(k_b2, (out_ch,), jnp.float32),
        "b3": 0.1 * jax.random.normal(k_b3, (out_ch,), jnp.float32),
    }

    fwd = jax.jit(functools.partial(
        conv_transpose4d_forward, stride=stride, padding=padding, output_padding=output_padding))
    out = jax.block_until_ready(fwd(x, params))

    ref = _ref_forward(x, params, stride, padding, output_padding)
    assert out.shape == ref.shape == (batch, out_ch, 3, 16, 16, 16), (out.shape, ref.shape)
    # bf16 MXU operands (f32 accumulation) -> tolerance relaxed vs the old pure-f32 path.
    np.testing.assert_allclose(np.asarray(out), np.asarray(ref), rtol=2e-2, atol=2e-2)

    print("KERNEL_OK")
</pallas_src>

<mosaic_0001>
module attributes {stable_mosaic.version = 11 : i64} {
  func.func @_polyphase_matmul_kernel(%arg0: i32, %arg1: memref<32x104xbf16, #tpu.memory_space<vmem>>, %arg2: memref<104x1536xbf16, #tpu.memory_space<vmem>>, %arg3: memref<32x1536xf32, #tpu.memory_space<vmem>>) attributes {dimension_semantics = [#tpu.dimension_semantics<parallel>], iteration_bounds = array<i64: 2>, scalar_prefetch = 0 : i64, scratch_operands = 0 : i64, tpu.core_type = #tpu.core_type<tc>, window_params = [{pipeline_mode = #tpu.pipeline_mode<synchronous>, transform_indices = @transform_0, window_bounds = array<i64: 32, 104>}, {transform_indices = @transform_1, window_bounds = array<i64: 104, 1536>}, {transform_indices = @transform_2, window_bounds = array<i64: 32, 1536>}]} {
    %c0 = arith.constant 0 : index
    %c0_0 = arith.constant 0 : index
    %0 = vector.load %arg1[%c0, %c0_0] : memref<32x104xbf16, #tpu.memory_space<vmem>>, vector<32x104xbf16>
    %c0_1 = arith.constant 0 : index
    %c0_2 = arith.constant 0 : index
    %1 = vector.load %arg2[%c0_1, %c0_2] : memref<104x1536xbf16, #tpu.memory_space<vmem>>, vector<104x1536xbf16>
    %cst = arith.constant dense<0.000000e+00> : vector<32x1536xf32>
    %2 = tpu.matmul %0, %1, %cst {dimension_numbers = #tpu.dot_dimension_numbers<[1], [0], [0], [1], [0, 0, 1, 1], [], []>} : vector<32x104xbf16>, vector<104x1536xbf16>, vector<32x1536xf32> -> vector<32x1536xf32>
    %c0_3 = arith.constant 0 : index
    %c0_4 = arith.constant 0 : index
    %3 = vector.load %arg3[%c0_3, %c0_4] : memref<32x1536xf32, #tpu.memory_space<vmem>>, vector<32x1536xf32>
    tpu.vector_store %arg3[%c0_3, %c0_4], %2 {strides = array<i32>} : memref<32x1536xf32, #tpu.memory_space<vmem>>, vector<32x1536xf32>,
    return
  }
  func.func @transform_0(%arg0: i32) -> (i32, i32) {
    %c0_i32 = arith.constant 0 : i32
    %c0_i32_0 = arith.constant 0 : i32
    %c0_i32_1 = arith.constant 0 : i32
    return %c0_i32, %c0_i32_0 : i32, i32
  }
  func.func @transform_1(%arg0: i32) -> (i32, i32) {
    %c0_i32 = arith.constant 0 : i32
    %c0_i32_0 = arith.constant 0 : i32
    return %c0_i32, %arg0 : i32, i32
  }
  func.func @transform_2(%arg0: i32) -> (i32, i32) {
    %c0_i32 = arith.constant 0 : i32
    %c0_i32_0 = arith.constant 0 : i32
    return %c0_i32, %arg0 : i32, i32
  }
}

</mosaic_0001>

<bundles_post_ra>
// kernel: tile.1
= control target key start
LH: loop header
LB: loop body
LE: loop exit
PB: predicated region body
PF: predicated region fallthrough
CT: control target
= control target key end

     0   :  { %vm20_vm0 = vcmask 7168   ;;  %s93_s8 = smov 125   ;;  %s94_s9 = smov 126   ;;  %s114_s0 = inlined_call_operand.vmem [shape: bf16[8,4], index: 0, kind: input, shape index: {}]   ;;  %s115_s1 = inlined_call_operand.vmem [shape: bf16[32,1], index: 1, kind: output, shape index: {}]  }
   0x1   :  { %v15_v0 = vld [vmem:[%s114_s0] sm:$0xf]  ;;  %s92_s0 = smov 127  }
   0x2   :  { %v16_v1 = vunpack.c.l.bf16 %v15_v0 }
   0x4   :  { %23 = vrot.lane.b32.xlu0 %v16_v1, %s92_s0  ;;  %35 = vrot.lane.b32.xlu1 %v16_v1, %s93_s8  ;;  %21 = vst.msk [vmem:[#allocation0] ss:$4 sm:$0xff] %vm20_vm0, %v16_v1  }
   0x8   :  { %29 = vrot.lane.b32.xlu0 %v16_v1, %s94_s9 }
  0x76   :  { %v24_v2 = vpop.permute.xlu0 %23   ;;  %v36_v3 = vpop.permute.xlu1 %35  }
  0x77   :  { %27 = vst.msk [vmem:[#allocation0 + $0x1] ss:$4 sm:$0xff] %vm20_vm0, %v24_v2   ;;  %39 = vst.msk [vmem:[#allocation0 + $0x3] ss:$4 sm:$0xff] %vm20_vm0, %v36_v3  }
  0x7a   :  { %v30_v4 = vpop.permute.xlu0 %29  }
  0x7b   :  { %33 = vst.msk [vmem:[#allocation0 + $0x2] ss:$4 sm:$0xff] %vm20_vm0, %v30_v4  }
  0x82   :  { %v45_v5 = vld [vmem:[#allocation0] sm:$0xff]  ;;  %v51_v6 = vld [vmem:[#allocation0 + $0x8] sm:$0xff]  ;;  %v58_v7 = vld [vmem:[#allocation0 + $0x10] sm:$0xff] }
  0x83   :  { %v81_v8 = vpack.c.bf16 %v51_v6, %v45_v5  ;;  %v66_v9 = vld [vmem:[#allocation0 + $0x18] sm:$0xff] }
  0x84   :  { %v86_v10 = vpack.c.bf16 %v66_v9, %v58_v7 }
  0x85   :  { %82 = vst [vmem:[%s115_s1] sm:$0xff] %v81_v8  }
  0x86   :  { %88 = vst [vmem:[%s115_s1 + $0x8] sm:$0xff] %v86_v10  }

// kernel: conv_transpose4d_forward.1
= control target key start
LH: loop header
LB: loop body
LE: loop exit
PB: predicated region body
PF: predicated region fallthrough
CT: control target
= control target key end

     0   :  { %s1689_s9 = smov 0   ;;  %s1691_s10 = smov 0   ;;  %s2199_s0 = inlined_call_operand.vmem [shape: bf16[32,104], index: 0, kind: input, shape index: {}]   ;;  %s2200_s1 = inlined_call_operand.vmem [shape: bf16[104,3072], index: 1, kind: input, shape index: {}]   ;;  %s2201_s2 = inlined_call_operand.vmem [shape: f32[32,3072], index: 2, kind: output, shape index: {}]  }
   0x1   :  { %s1693_s11 = smov 0  }
   0x2 LB: > { %s1384_s12 = sadd.s32 4294967295, %s1671_s11   ;;  %s1706_s13 = sadd.s32 1, %s1671_s11   ;;  %s1671_s11 = sphi %s1693_s11, %s2205_s11   ;;  %s1667_s10 = sphi %s1691_s10, %s2204_s10   ;;  %s1663_s9 = sphi %s1689_s9, %s2203_s9  }
   0x3   : > { %s37_s14 = ssub.s32 %s1671_s11, %s1706_s13  ;;  %s40_s15 = sadd.s32 1, %s1667_s10 }
   0x4   : > { %p38_p0 = scmp.eq.s32.totalorder %s37_s14, 0  ;;  %p47_p1 = scmp.ne.s32.totalorder %s1667_s10, %s1663_s9 }
   0x5   : > { %p48_p2 = scmp.eq.s32.totalorder %s1671_s11, 0  ;;  %p77_p3 = scmp.eq.s32.totalorder %s1384_s12, 1 }
   0x6   : > { %s1717_s16 = scalar_select %p38_p0, %s1667_s10, %s40_s15  }
   0x7   : > { %p49_p4 = por %p48_p2, %p47_p1  ;;  %p1719_p5 = por %p77_p3, %p47_p1 }
   0x8   : > { %p1387_p6 = scmp.ge.s32.totalorder %s1671_s11, 2 }
   0xa   : > { %102 = sbr.rel (%p1387_p6) target bundleno = 59 (0x3b), region = 20 }
   0xf   : > { %105 = sbr.rel (!%p49_p4) target bundleno = 59 (0x3b), region = 24  ;;  %s107_s18 = sand.u32 (%p49_p4), 1, %s1667_s10  }
  0x10   : > { %s1497_s19 = smul.u32 (%p49_p4), 48, %s1671_s11 }
  0x11   : > { %s1499_s20 = smul.u32 (%p49_p4), 624, %s107_s18 }
  0x12   : > { %s1729_s23 = scalar_lea.vmem (%p49_p4), %s2200_s1, %s1497_s19 }
  0x13   : > { %v125_v0 = vld [vmem:[%s1729_s23] sm:$0xff] (%p49_p4)  ;;  %v127_v1 = vld [vmem:[%s1729_s23 + $0x8] sm:$0xff] (%p49_p4)  ;;  %v129_v2 = vld [vmem:[%s1729_s23 + $0x10] sm:$0xff] (%p49_p4)  ;;  %s1734_s24 = scalar_lea.vmem (%p49_p4), [#allocation2], %s1499_s20 }
  0x14   : > { %126 = vst [vmem:[%s1734_s24] sm:$0xff] %v125_v0  ;;  %128 = vst [vmem:[%s1734_s24 + $0x8] sm:$0xff] %v127_v1  ;;  %v131_v3 = vld [vmem:[%s1729_s23 + $0x18] sm:$0xff]  ;;  %v133_v4 = vld [vmem:[%s1729_s23 + $0x20] sm:$0xff] }
  0x15   : > { %130 = vst [vmem:[%s1734_s24 + $0x10] sm:$0xff] %v129_v2  ;;  %v135_v5 = vld [vmem:[%s1729_s23 + $0x28] sm:$0xff]  ;;  %132 = vst [vmem:[%s1734_s24 + $0x18] sm:$0xff] %v131_v3  ;;  %v137_v6 = vld [vmem:[%s1729_s23 + $0x60] sm:$0xff] }
  0x16   : > { %134 = vst [vmem:[%s1734_s24 + $0x20] sm:$0xff] %v133_v4  ;;  %136 = vst [vmem:[%s1734_s24 + $0x28] sm:$0xff] %v135_v5  ;;  %v139_v7 = vld [vmem:[%s1729_s23 + $0x68] sm:$0xff]  ;;  %v141_v8 = vld [vmem:[%s1729_s23 + $0x70] sm:$0xff] }
  0x17   : > { %138 = vst [vmem:[%s1734_s24 + $0x30] sm:$0xff] %v137_v6  ;;  %140 = vst [vmem:[%s1734_s24 + $0x38] sm:$0xff] %v139_v7  ;;  %v143_v9 = vld [vmem:[%s1729_s23 + $0x78] sm:$0xff]  ;;  %v145_v10 = vld [vmem:[%s1729_s23 + $0x80] sm:$0xff] }
  0x18   : > { %142 = vst [vmem:[%s1734_s24 + $0x40] sm:$0xff] %v141_v8  ;;  %v147_v11 = vld [vmem:[%s1729_s23 + $0x88] sm:$0xff]  ;;  %144 = vst [vmem:[%s1734_s24 + $0x48] sm:$0xff] %v143_v9  ;;  %v149_v12 = vld [vmem:[%s1729_s23 + $0xc0] sm:$0xff] }
  0x19   : > { %146 = vst [vmem:[%s1734_s24 + $0x50] sm:$0xff] %v145_v10  ;;  %148 = vst [vmem:[%s1734_s24 + $0x58] sm:$0xff] %v147_v11  ;;  %v151_v13 = vld [vmem:[%s1729_s23 + $0xc8] sm:$0xff]  ;;  %v153_v14 = vld [vmem:[%s1729_s23 + $0xd0] sm:$0xff] }
  0x1a   : > { %150 = vst [vmem:[%s1734_s24 + $0x60] sm:$0xff] %v149_v12  ;;  %152 = vst [vmem:[%s1734_s24 + $0x68] sm:$0xff] %v151_v13  ;;  %v155_v15 = vld [vmem:[%s1729_s23 + $0xd8] sm:$0xff]  ;;  %v157_v16 = vld [vmem:[%s1729_s23 + $0xe0] sm:$0xff] }
  0x1b   : > { %154 = vst [vmem:[%s1734_s24 + $0x70] sm:$0xff] %v153_v14  ;;  %v159_v17 = vld [vmem:[%s1729_s23 + $0xe8] sm:$0xff]  ;;  %156 = vst [vmem:[%s1734_s24 + $0x78] sm:$0xff] %v155_v15  ;;  %v161_v18 = vld [vmem:[%s1729_s23 + $0x120] sm:$0xff] }
  0x1c   : > { %158 = vst [vmem:[%s1734_s24 + $0x80] sm:$0xff] %v157_v16  ;;  %160 = vst [vmem:[%s1734_s24 + $0x88] sm:$0xff] %v159_v17  ;;  %v163_v19 = vld [vmem:[%s1729_s23 + $0x128] sm:$0xff]  ;;  %v165_v20 = vld [vmem:[%s1729_s23 + $0x130] sm:$0xff] }
  0x1d   : > { %162 = vst [vmem:[%s1734_s24 + $0x90] sm:$0xff] %v161_v18  ;;  %164 = vst [vmem:[%s1734_s24 + $0x98] sm:$0xff] %v163_v19  ;;  %v167_v21 = vld [vmem:[%s1729_s23 + $0x138] sm:$0xff]  ;;  %v169_v22 = vld [vmem:[%s1729_s23 + $0x140] sm:$0xff] }
  0x1e   : > { %166 = vst [vmem:[%s1734_s24 + $0xa0] sm:$0xff] %v165_v20  ;;  %v171_v23 = vld [vmem:[%s1729_s23 + $0x148] sm:$0xff]  ;;  %168 = vst [vmem:[%s1734_s24 + $0xa8] sm:$0xff] %v167_v21  ;;  %v173_v24 = vld [vmem:[%s1729_s23 + $0x180] sm:$0xff] }
  0x1f   : > { %170 = vst [vmem:[%s1734_s24 + $0xb0] sm:$0xff] %v169_v22  ;;  %172 = vst [vmem:[%s1734_s24 + $0xb8] sm:$0xff] %v171_v23  ;;  %v175_v25 = vld [vmem:[%s1729_s23 + $0x188] sm:$0xff]  ;;  %v177_v26 = vld [vmem:[%s1729_s23 + $0x190] sm:$0xff] }
  0x20   : > { %174 = vst [vmem:[%s1734_s24 + $0xc0] sm:$0xff] %v173_v24  ;;  %176 = vst [vmem:[%s1734_s24 + $0xc8] sm:$0xff] %v175_v25  ;;  %v179_v27 = vld [vmem:[%s1729_s23 + $0x198] sm:$0xff]  ;;  %v181_v28 = vld [vmem:[%s1729_s23 + $0x1a0] sm:$0xff] }
  0x21   : > { %178 = vst [vmem:[%s1734_s24 + $0xd0] sm:$0xff] %v177_v26  ;;  %v183_v29 = vld [vmem:[%s1729_s23 + $0x1a8] sm:$0xff]  ;;  %180 = vst [vmem:[%s1734_s24 + $0xd8] sm:$0xff] %v179_v27  ;;  %v185_v30 = vld [vmem:[%s1729_s23 + $0x1e0] sm:$0xff] }
  0x22   : > { %182 = vst [vmem:[%s1734_s24 + $0xe0] sm:$0xff] %v181_v28  ;;  %184 = vst [vmem:[%s1734_s24 + $0xe8] sm:$0xff] %v183_v29  ;;  %v187_v31 = vld [vmem:[%s1729_s23 + $0x1e8] sm:$0xff]  ;;  %v189_v32 = vld [vmem:[%s1729_s23 + $0x1f0] sm:$0xff] }
  0x23   : > { %186 = vst [vmem:[%s1734_s24 + $0xf0] sm:$0xff] %v185_v30  ;;  %188 = vst [vmem:[%s1734_s24 + $0xf8] sm:$0xff] %v187_v31  ;;  %v191_v33 = vld [vmem:[%s1729_s23 + $0x1f8] sm:$0xff]  ;;  %v193_v34 = vld [vmem:[%s1729_s23 + $0x200] sm:$0xff] }
  0x24   : > { %190 = vst [vmem:[%s1734_s24 + $0x100] sm:$0xff] %v189_v32  ;;  %v195_v35 = vld [vmem:[%s1729_s23 + $0x208] sm:$0xff]  ;;  %192 = vst [vmem:[%s1734_s24 + $0x108] sm:$0xff] %v191_v33  ;;  %v197_v36 = vld [vmem:[%s1729_s23 + $0x240] sm:$0xff] }
  0x25   : > { %194 = vst [vmem:[%s1734_s24 + $0x110] sm:$0xff] %v193_v34  ;;  %196 = vst [vmem:[%s1734_s24 + $0x118] sm:$0xff] %v195_v35  ;;  %v199_v37 = vld [vmem:[%s1729_s23 + $0x248] sm:$0xff]  ;;  %v201_v38 = vld [vmem:[%s1729_s23 + $0x250] sm:$0xff] }
  0x26   : > { %198 = vst [vmem:[%s1734_s24 + $0x120] sm:$0xff] %v197_v36  ;;  %200 = vst [vmem:[%s1734_s24 + $0x128] sm:$0xff] %v199_v37  ;;  %v203_v39 = vld [vmem:[%s1729_s23 + $0x258] sm:$0xff]  ;;  %v205_v40 = vld [vmem:[%s1729_s23 + $0x260] sm:$0xff] }
  0x27   : > { %202 = vst [vmem:[%s1734_s24 + $0x130] sm:$0xff] %v201_v38  ;;  %v207_v41 = vld [vmem:[%s1729_s23 + $0x268] sm:$0xff]  ;;  %204 = vst [vmem:[%s1734_s24 + $0x138] sm:$0xff] %v203_v39  ;;  %v209_v42 = vld [vmem:[%s1729_s23 + $0x2a0] sm:$0xff] }
  0x28   : > { %206 = vst [vmem:[%s1734_s24 + $0x140] sm:$0xff] %v205_v40  ;;  %208 = vst [vmem:[%s1734_s24 + $0x148] sm:$0xff] %v207_v41  ;;  %v211_v43 = vld [vmem:[%s1729_s23 + $0x2a8] sm:$0xff]  ;;  %v213_v44 = vld [vmem:[%s1729_s23 + $0x2b0] sm:$0xff] }
  0x29   : > { %210 = vst [vmem:[%s1734_s24 + $0x150] sm:$0xff] %v209_v42  ;;  %212 = vst [vmem:[%s1734_s24 + $0x158] sm:$0xff] %v211_v43  ;;  %v215_v45 = vld [vmem:[%s1729_s23 + $0x2b8] sm:$0xff]  ;;  %v217_v46 = vld [vmem:[%s1729_s23 + $0x2c0] sm:$0xff] }
  0x2a   : > { %214 = vst [vmem:[%s1734_s24 + $0x160] sm:$0xff] %v213_v44  ;;  %v219_v47 = vld [vmem:[%s1729_s23 + $0x2c8] sm:$0xff]  ;;  %216 = vst [vmem:[%s1734_s24 + $0x168] sm:$0xff] %v215_v45  ;;  %v221_v48 = vld [vmem:[%s1729_s23 + $0x300] sm:$0xff] }
  0x2b   : > { %218 = vst [vmem:[%s1734_s24 + $0x170] sm:$0xff] %v217_v46  ;;  %220 = vst [vmem:[%s1734_s24 + $0x178] sm:$0xff] %v219_v47  ;;  %v223_v49 = vld [vmem:[%s1729_s23 + $0x308] sm:$0xff]  ;;  %v225_v50 = vld [vmem:[%s1729_s23 + $0x310] sm:$0xff] }
  0x2c   : > { %222 = vst [vmem:[%s1734_s24 + $0x180] sm:$0xff] %v221_v48  ;;  %224 = vst [vmem:[%s1734_s24 + $0x188] sm:$0xff] %v223_v49  ;;  %v227_v51 = vld [vmem:[%s1729_s23 + $0x318] sm:$0xff]  ;;  %v229_v52 = vld [vmem:[%s1729_s23 + $0x320] sm:$0xff] }
  0x2d   : > { %226 = vst [vmem:[%s1734_s24 + $0x190] sm:$0xff] %v225_v50  ;;  %v231_v53 = vld [vmem:[%s1729_s23 + $0x328] sm:$0xff]  ;;  %228 = vst [vmem:[%s1734_s24 + $0x198] sm:$0xff] %v227_v51  ;;  %v233_v54 = vld [vmem:[%s1729_s23 + $0x360] sm:$0xff] }
  0x2e   : > { %230 = vst [vmem:[%s1734_s24 + $0x1a0] sm:$0xff] %v229_v52  ;;  %232 = vst [vmem:[%s1734_s24 + $0x1a8] sm:$0xff] %v231_v53  ;;  %v235_v55 = vld [vmem:[%s1729_s23 + $0x368] sm:$0xff]  ;;  %v237_v56 = vld [vmem:[%s1729_s23 + $0x370] sm:$0xff] }
  0x2f   : > { %234 = vst [vmem:[%s1734_s24 + $0x1b0] sm:$0xff] %v233_v54  ;;  %236 = vst [vmem:[%s1734_s24 + $0x1b8] sm:$0xff] %v235_v55  ;;  %v239_v57 = vld [vmem:[%s1729_s23 + $0x378] sm:$0xff]  ;;  %v241_v58 = vld [vmem:[%s1729_s23 + $0x380] sm:$0xff] }
  0x30   : > { %238 = vst [vmem:[%s1734_s24 + $0x1c0] sm:$0xff] %v237_v56  ;;  %v243_v59 = vld [vmem:[%s1729_s23 + $0x388] sm:$0xff]  ;;  %240 = vst [vmem:[%s1734_s24 + $0x1c8] sm:$0xff] %v239_v57  ;;  %v245_v60 = vld [vmem:[%s1729_s23 + $0x3c0] sm:$0xff] }
  0x31   : > { %242 = vst [vmem:[%s1734_s24 + $0x1d0] sm:$0xff] %v241_v58  ;;  %244 = vst [vmem:[%s1734_s24 + $0x1d8] sm:$0xff] %v243_v59  ;;  %v247_v61 = vld [vmem:[%s1729_s23 + $0x3c8] sm:$0xff]  ;;  %v249_v62 = vld [vmem:[%s1729_s23 + $0x3d0] sm:$0xff] }
  0x32   : > { %246 = vst [vmem:[%s1734_s24 + $0x1e0] sm:$0xff] %v245_v60  ;;  %248 = vst [vmem:[%s1734_s24 + $0x1e8] sm:$0xff] %v247_v61  ;;  %v251_v63 = vld [vmem:[%s1729_s23 + $0x3d8] sm:$0xff]  ;;  %v253_v0 = vld [vmem:[%s1729_s23 + $0x3e0] sm:$0xff] }
  0x33   : > { %250 = vst [vmem:[%s1734_s24 + $0x1f0] sm:$0xff] %v249_v62  ;;  %v255_v1 = vld [vmem:[%s1729_s23 + $0x3e8] sm:$0xff]  ;;  %252 = vst [vmem:[%s1734_s24 + $0x1f8] sm:$0xff] %v251_v63  ;;  %v257_v2 = vld [vmem:[%s1729_s23 + $0x420] sm:$0xff] }
  0x34   : > { %254 = vst [vmem:[%s1734_s24 + $0x200] sm:$0xff] %v253_v0  ;;  %256 = vst [vmem:[%s1734_s24 + $0x208] sm:$0xff] %v255_v1  ;;  %v259_v3 = vld [vmem:[%s1729_s23 + $0x428] sm:$0xff]  ;;  %v261_v4 = vld [vmem:[%s1729_s23 + $0x430] sm:$0xff] }
  0x35   : > { %258 = vst [vmem:[%s1734_s24 + $0x210] sm:$0xff] %v257_v2  ;;  %260 = vst [vmem:[%s1734_s24 + $0x218] sm:$0xff] %v259_v3  ;;  %v263_v5 = vld [vmem:[%s1729_s23 + $0x438] sm:$0xff]  ;;  %v265_v6 = vld [vmem:[%s1729_s23 + $0x440] sm:$0xff] }
  0x36   : > { %262 = vst [vmem:[%s1734_s24 + $0x220] sm:$0xff] %v261_v4  ;;  %v267_v7 = vld [vmem:[%s1729_s23 + $0x448] sm:$0xff]  ;;  %264 = vst [vmem:[%s1734_s24 + $0x228] sm:$0xff] %v263_v5  ;;  %v269_v8 = vld [vmem:[%s1729_s23 + $0x480] sm:$0xff] }
  0x37   : > { %266 = vst [vmem:[%s1734_s24 + $0x230] sm:$0xff] %v265_v6  ;;  %268 = vst [vmem:[%s1734_s24 + $0x238] sm:$0xff] %v267_v7  ;;  %v271_v9 = vld [vmem:[%s1729_s23 + $0x488] sm:$0xff]  ;;  %v273_v10 = vld [vmem:[%s1729_s23 + $0x490] sm:$0xff] }
  0x38   : > { %270 = vst [vmem:[%s1734_s24 + $0x240] sm:$0xff] %v269_v8  ;;  %272 = vst [vmem:[%s1734_s24 + $0x248] sm:$0xff] %v271_v9  ;;  %v275_v11 = vld [vmem:[%s1729_s23 + $0x498] sm:$0xff]  ;;  %v277_v12 = vld [vmem:[%s1729_s23 + $0x4a0] sm:$0xff] }
  0x39   : > { %274 = vst [vmem:[%s1734_s24 + $0x250] sm:$0xff] %v273_v10  ;;  %v279_v13 = vld [vmem:[%s1729_s23 + $0x4a8] sm:$0xff]  ;;  %276 = vst [vmem:[%s1734_s24 + $0x258] sm:$0xff] %v275_v11 }
  0x3a   : > { %278 = vst [vmem:[%s1734_s24 + $0x260] sm:$0xff] %v277_v12  ;;  %280 = vst [vmem:[%s1734_s24 + $0x268] sm:$0xff] %v279_v13 }
  0x3b PF: > { %p1389_p7 = scmp.ge.s32.totalorder %s1671_s11, 1  ;;  %p285_p8 = scmp.lt.s32.totalorder %s1671_s11, 3 }
  0x3d   : > { %p286_p9 = pnand %p1389_p7, %p285_p8 }
  0x3e   : > { %s292_s25 = sand.u32 (!%p286_p9), 1, %s1663_s9  }
  0x3f   : > { %289 = sbr.rel (%p286_p9) target bundleno = 372 (0x174), region = 47 }
  0x40   : > { %s1500_s26 = smul.u32 (!%p286_p9), 624, %s292_s25 }
  0x41   : > { %s1501_s4 = smul.u32 (!%p286_p9), 384, %s292_s25 }
  0x42   : > { %s1896_s27 = scalar_lea.vmem (!%p286_p9), [#allocation2], %s1500_s26 }
  0x43   : > { %s2034_s5 = scalar_lea.vmem (!%p286_p9), [#allocation3], %s1501_s4 }
  0x44   : > { %v1673_v14 = vmov 0   ;;  %v391_v15 = vld [vmem:[%s1896_s27 + $0x240] sm:$0xff]  ;;  %vm804_vm0 = vcmask 1043456   ;;  %v392_v16 = vld [vmem:[%s1896_s27 + $0x248] sm:$0xff]  ;;  %v393_v45 = vld [vmem:[%s1896_s27 + $0x250] sm:$0xff]  ;;  %vm797_vm1 = vcmask 850944  }
  0x45   : > { %873 = vmatprep.mubr.bf16.mxu0 %v1673_v14  ;;  %926 = vmatprep.mubr.bf16.mxu1 %v1673_v14  ;;  %v1465_v17 = vcombine.high %v391_v15, %v391_v15  ;;  %v1467_v18 = vcombine.high %v392_v16, %v392_v16  ;;  %v1464_v19 = vcombine.low %v391_v15, %v391_v15  ;;  %v1531_v21 = vld [vmem:[%s1896_s27 + $0x1e4] ss:$48 sps:$4 sm:$0xff]   ;;  %v1533_v22 = vld [vmem:[%s1896_s27 + $0x1ec] ss:$48 sps:$4 sm:$0xff]   ;;  %v1535_v25 = vld [vmem:[%s1896_s27 + $0x1e0] ss:$48 sps:$4 sm:$0xff]  }
  0x46   : > { %v1466_v20 = vcombine.low %v392_v16, %v392_v16  ;;  %v1536_v26 = vld [vmem:[%s1896_s27 + $0x1e8] ss:$48 sps:$4 sm:$0xff]   ;;  %v1537_v27 = vld [vmem:[%s1896_s27 + $0x184] ss:$48 sps:$4 sm:$0xff]   ;;  %v1539_v28 = vld [vmem:[%s1896_s27 + $0x18c] ss:$48 sps:$4 sm:$0xff]   ;;  %v1469_v49 = vcombine.high %v393_v45, %v393_v45  ;;  %v1468_v51 = vcombine.low %v393_v45, %v393_v45 }
  0x47   : > { %1476 = vmatprep.subr.msk.bf16.mxu0 %vm804_vm0, %v1465_v17  ;;  %1479 = vmatprep.subr.msk.bf16.mxu1 %vm804_vm0, %v1467_v18  ;;  %v806_v23 = vsel %vm804_vm0, %v1464_v19, 0  ;;  %v1541_v29 = vld [vmem:[%s1896_s27 + $0x180] ss:$48 sps:$4 sm:$0xff]   ;;  %v1542_v30 = vld [vmem:[%s1896_s27 + $0x188] ss:$48 sps:$4 sm:$0xff]   ;;  %s1498_s6 = smul.u32 (%p1719_p5), 96, %s1384_s12 }
  0x48   : > { %v812_v24 = vsel %vm804_vm0, %v1466_v20, 0  ;;  %844 = vmatpush1.bf16.msra.mxu0 %v806_v23  ;;  %v1543_v31 = vld [vmem:[%s1896_s27 + $0x124] ss:$48 sps:$4 sm:$0xff]   ;;  %v1545_v32 = vld [vmem:[%s1896_s27 + $0x12c] ss:$48 sps:$4 sm:$0xff]   ;;  %v818_v55 = vsel %vm804_vm0, %v1468_v51, 0 }
  0x49   : > { %897 = vmatpush1.bf16.msra.mxu1 %v812_v24  ;;  %845 = vmatprep.subr.bf16.mxu0 %v1531_v21  ;;  %v1547_v33 = vld [vmem:[%s1896_s27 + $0x120] ss:$48 sps:$4 sm:$0xff]   ;;  %v1548_v34 = vld [vmem:[%s1896_s27 + $0x128] ss:$48 sps:$4 sm:$0xff]   ;;  %v1549_v35 = vld [vmem:[%s1896_s27 + $0xc4] ss:$48 sps:$4 sm:$0xff]   ;;  %s2097_s9 = scalar_lea.vmem (%p1719_p5), %s2201_s2, %s1498_s6 }
  0x4a   : > { %898 = vmatprep.subr.bf16.mxu1 %v1533_v22  ;;  %v1551_v36 = vld [vmem:[%s1896_s27 + $0xcc] ss:$48 sps:$4 sm:$0xff]   ;;  %v1553_v37 = vld [vmem:[%s1896_s27 + $0xc0] ss:$48 sps:$4 sm:$0xff]   ;;  %v1554_v38 = vld [vmem:[%s1896_s27 + $0xc8] ss:$48 sps:$4 sm:$0xff]  }
  0x4b   : > { %v1555_v39 = vld [vmem:[%s1896_s27 + $0x64] ss:$48 sps:$4 sm:$0xff]   ;;  %v1557_v40 = vld [vmem:[%s1896_s27 + $0x6c] ss:$48 sps:$4 sm:$0xff]   ;;  %v1559_v41 = vld [vmem:[%s1896_s27 + $0x60] ss:$48 sps:$4 sm:$0xff]  }
  0x4c   : > { %846 = vmatpush1.bf16.msra.mxu0 %v1535_v25  ;;  %v1560_v42 = vld [vmem:[%s1896_s27 + $0x68] ss:$48 sps:$4 sm:$0xff]   ;;  %v1561_v43 = vld [vmem:[%s1896_s27 + $0x4] ss:$48 sps:$4 sm:$0xff]   ;;  %v1563_v44 = vld [vmem:[%s1896_s27 + $0xc] ss:$48 sps:$4 sm:$0xff]  }
  0x4d   : > { %899 = vmatpush1.bf16.msra.mxu1 %v1536_v26  ;;  %847 = vmatprep.subr.bf16.mxu0 %v1537_v27  ;;  %v394_v46 = vld [vmem:[%s1896_s27 + $0x258] sm:$0xff]  ;;  %v1565_v47 = vld [vmem:[%s1896_s27] ss:$48 sps:$4 sm:$0xff]   ;;  %v1574_v54 = vld [vmem:[%s1896_s27 + $0x1f4] ss:$48 sps:$4 sm:$0xff]  }
  0x4e   : > { %900 = vmatprep.subr.bf16.mxu1 %v1539_v28  ;;  %v1566_v48 = vld [vmem:[%s1896_s27 + $0x8] ss:$48 sps:$4 sm:$0xff]   ;;  %v1471_v50 = vcombine.high %v394_v46, %v394_v46  ;;  %v1470_v52 = vcombine.low %v394_v46, %v394_v46  ;;  %v1933_v53 = vld [vmem:[%s2199_s0] sm:$0xff]   ;;  %v1577_v57 = vld [vmem:[%s1896_s27 + $0x1fc] ss:$48 sps:$4 sm:$0xff]  }
  0x4f   : > { %v1572_v58 = vld [vmem:[%s1896_s27 + $0x1f0] ss:$48 sps:$4 sm:$0xff]   ;;  %v1575_v59 = vld [vmem:[%s1896_s27 + $0x1f8] ss:$48 sps:$4 sm:$0xff]   ;;  %v1580_v60 = vld [vmem:[%s1896_s27 + $0x194] ss:$48 sps:$4 sm:$0xff]  }
  0x50   : > { %848 = vmatpush1.bf16.msra.mxu0 %v1541_v29  ;;  %v824_v56 = vsel %vm804_vm0, %v1470_v52, 0  ;;  %v1583_v61 = vld [vmem:[%s1896_s27 + $0x19c] ss:$48 sps:$4 sm:$0xff]   ;;  %v1578_v63 = vld [vmem:[%s1896_s27 + $0x190] ss:$48 sps:$4 sm:$0xff]  }
  0x51   : > { %901 = vmatpush1.bf16.msra.mxu1 %v1542_v30  ;;  %849 = vmatprep.subr.bf16.mxu0 %v1543_v31  ;;  %v1954_v62 = vld [vmem:[%s2199_s0 + $0x8] sm:$0xff]   ;;  %v1586_v1 = vld [vmem:[%s1896_s27 + $0x134] ss:$48 sps:$4 sm:$0xff]   ;;  %v1584_v3 = vld [vmem:[%s1896_s27 + $0x130] ss:$48 sps:$4 sm:$0xff]  }
  0x52   : > { %902 = vmatprep.subr.bf16.mxu1 %v1545_v32  ;;  %v1581_v0 = vld [vmem:[%s1896_s27 + $0x198] ss:$48 sps:$4 sm:$0xff]   ;;  %v1589_v2 = vld [vmem:[%s1896_s27 + $0x13c] ss:$48 sps:$4 sm:$0xff]   ;;  %v1593_v5 = vld [vmem:[%s1896_s27 + $0xd4] ss:$48 sps:$4 sm:$0xff]  }
  0x53   : > { %v1587_v4 = vld [vmem:[%s1896_s27 + $0x138] ss:$48 sps:$4 sm:$0xff]   ;;  %v1596_v6 = vld [vmem:[%s1896_s27 + $0xdc] ss:$48 sps:$4 sm:$0xff]   ;;  %v1591_v7 = vld [vmem:[%s1896_s27 + $0xd0] ss:$48 sps:$4 sm:$0xff]  }
  0x54   : > { %850 = vmatpush1.bf16.msra.mxu0 %v1547_v33  ;;  %v1594_v8 = vld [vmem:[%s1896_s27 + $0xd8] ss:$48 sps:$4 sm:$0xff]   ;;  %v1599_v9 = vld [vmem:[%s1896_s27 + $0x74] ss:$48 sps:$4 sm:$0xff]   ;;  %v1602_v10 = vld [vmem:[%s1896_s27 + $0x7c] ss:$48 sps:$4 sm:$0xff]  }
  0x55   : > { %903 = vmatpush1.bf16.msra.mxu1 %v1548_v34  ;;  %851 = vmatprep.subr.bf16.mxu0 %v1549_v35  ;;  %v1597_v11 = vld [vmem:[%s1896_s27 + $0x70] ss:$48 sps:$4 sm:$0xff]   ;;  %v1600_v12 = vld [vmem:[%s1896_s27 + $0x78] ss:$48 sps:$4 sm:$0xff]   ;;  %v1605_v13 = vld [vmem:[%s1896_s27 + $0x14] ss:$48 sps:$4 sm:$0xff]  }
  0x56   : > { %904 = vmatprep.subr.bf16.mxu1 %v1551_v36  ;;  %v1608_v15 = vld [vmem:[%s1896_s27 + $0x1c] ss:$48 sps:$4 sm:$0xff]   ;;  %v395_v16 = vld [vmem:[%s1896_s27 + $0x260] sm:$0xff]  ;;  %v1606_v19 = vld [vmem:[%s1896_s27 + $0x18] ss:$48 sps:$4 sm:$0xff]  }
  0x57   : > { %v396_v17 = vld [vmem:[%s1896_s27 + $0x268] sm:$0xff]  ;;  %v1603_v18 = vld [vmem:[%s1896_s27 + $0x10] ss:$48 sps:$4 sm:$0xff]   ;;  %v1473_v20 = vcombine.high %v395_v16, %v395_v16  ;;  %v1472_v22 = vcombine.low %v395_v16, %v395_v16  ;;  %v1615_v26 = vld [vmem:[%s1896_s27 + $0x204] ss:$48 sps:$4 sm:$0xff]  }
  0x58   : > { %852 = vmatpush1.bf16.msra.mxu0 %v1553_v37  ;;  %v1475_v21 = vcombine.high %v396_v17, %v396_v17  ;;  %v1474_v23 = vcombine.low %v396_v17, %v396_v17  ;;  %v1618_v27 = vld [vmem:[%s1896_s27 + $0x20c] ss:$48 sps:$4 sm:$0xff]   ;;  %v1613_v28 = vld [vmem:[%s1896_s27 + $0x200] ss:$48 sps:$4 sm:$0xff]   ;;  %v1616_v29 = vld [vmem:[%s1896_s27 + $0x208] ss:$48 sps:$4 sm:$0xff]  }
  0x59   : > { %905 = vmatpush1.bf16.msra.mxu1 %v1554_v38  ;;  %853 = vmatprep.subr.bf16.mxu0 %v1555_v39  ;;  %v830_v24 = vsel %vm804_vm0, %v1472_v22, 0  ;;  %v1621_v30 = vld [vmem:[%s1896_s27 + $0x1a4] ss:$48 sps:$4 sm:$0xff]   ;;  %v1624_v31 = vld [vmem:[%s1896_s27 + $0x1ac] ss:$48 sps:$4 sm:$0xff]  }
  0x5a   : > { %906 = vmatprep.subr.bf16.mxu1 %v1557_v40  ;;  %v836_v25 = vsel %vm804_vm0, %v1474_v23, 0  ;;  %v1619_v32 = vld [vmem:[%s1896_s27 + $0x1a0] ss:$48 sps:$4 sm:$0xff]   ;;  %v1622_v33 = vld [vmem:[%s1896_s27 + $0x1a8] ss:$48 sps:$4 sm:$0xff]  }
  0x5b   : > { %v1627_v34 = vld [vmem:[%s1896_s27 + $0x144] ss:$48 sps:$4 sm:$0xff]   ;;  %v1630_v35 = vld [vmem:[%s1896_s27 + $0x14c] ss:$48 sps:$4 sm:$0xff]   ;;  %v1625_v36 = vld [vmem:[%s1896_s27 + $0x140] ss:$48 sps:$4 sm:$0xff]  }
  0x5c   : > { %854 = vmatpush1.bf16.msra.mxu0 %v1559_v41  ;;  %v1628_v37 = vld [vmem:[%s1896_s27 + $0x148] ss:$48 sps:$4 sm:$0xff]   ;;  %v1633_v38 = vld [vmem:[%s1896_s27 + $0xe4] ss:$48 sps:$4 sm:$0xff]   ;;  %v1636_v39 = vld [vmem:[%s1896_s27 + $0xec] ss:$48 sps:$4 sm:$0xff]  }
  0x5d   : > { %907 = vmatpush1.bf16.msra.mxu1 %v1560_v42  ;;  %855 = vmatprep.subr.bf16.mxu0 %v1561_v43  ;;  %v1631_v40 = vld [vmem:[%s1896_s27 + $0xe0] ss:$48 sps:$4 sm:$0xff]   ;;  %v1634_v41 = vld [vmem:[%s1896_s27 + $0xe8] ss:$48 sps:$4 sm:$0xff]   ;;  %v1639_v42 = vld [vmem:[%s1896_s27 + $0x84] ss:$48 sps:$4 sm:$0xff]  }
  0x5e   : > { %908 = vmatprep.subr.bf16.mxu1 %v1563_v44  ;;  %v1642_v43 = vld [vmem:[%s1896_s27 + $0x8c] ss:$48 sps:$4 sm:$0xff]   ;;  %v1637_v44 = vld [vmem:[%s1896_s27 + $0x80] ss:$48 sps:$4 sm:$0xff]   ;;  %v1640_v45 = vld [vmem:[%s1896_s27 + $0x88] ss:$48 sps:$4 sm:$0xff]  }
  0x5f   : > { %v1645_v46 = vld [vmem:[%s1896_s27 + $0x24] ss:$48 sps:$4 sm:$0xff]  }
  0x60   : > { %856 = vmatpush1.bf16.msra.mxu0 %v1565_v47  ;;  %v1648_v47 = vld [vmem:[%s1896_s27 + $0x2c] ss:$48 sps:$4 sm:$0xff]  }
  0x61   : > { %909 = vmatpush1.bf16.msra.mxu1 %v1566_v48  ;;  %1482 = vmatprep.subr.msk.bf16.mxu0 %vm804_vm0, %v1469_v49  ;;  %v1643_v48 = vld [vmem:[%s1896_s27 + $0x20] ss:$48 sps:$4 sm:$0xff]   ;;  %v1646_v49 = vld [vmem:[%s1896_s27 + $0x28] ss:$48 sps:$4 sm:$0xff]  }
  0x62   : > { %1485 = vmatprep.subr.msk.bf16.mxu1 %vm804_vm0, %v1471_v50 }
  0x63   : > { %1477 = vmatmul.mubr.msk.bf16.vlgmr.msra.gmra.mxu0 %vm797_vm1, %v1933_v53 }
  0x64   : > { %1480 = vmatmul.mubr.msk.bf16.vlgmr.msra.gmra.mxu1 %vm797_vm1, %v1933_v53  ;;  %950 = vmatpush1.bf16.msra.mxu0 %v818_v55 }
  0x65   : > { %1003 = vmatpush1.bf16.msra.mxu1 %v824_v56  ;;  %951 = vmatprep.subr.bf16.mxu0 %v1574_v54 }
  0x66   : > { %1004 = vmatprep.subr.bf16.mxu1 %v1577_v57  ;;  %883 = vmatprep.mubr.bf16.mxu0 %v1673_v14 }
  0x67   : > { %936 = vmatprep.mubr.bf16.mxu1 %v1673_v14 }
  0x68   : > { %952 = vmatpush1.bf16.msra.mxu0 %v1572_v58 }
  0x69   : > { %1005 = vmatpush1.bf16.msra.mxu1 %v1575_v59  ;;  %953 = vmatprep.subr.bf16.mxu0 %v1580_v60 }
  0x6a   : > { %1006 = vmatprep.subr.bf16.mxu1 %v1583_v61 }
  0x6b   : > { %1478 = vmatmul.mubr.msk.bf16.gmra.mxu0 %vm797_vm1, %v1954_v62 }
  0x6c   : > { %1481 = vmatmul.mubr.msk.bf16.gmra.mxu1 %vm797_vm1, %v1954_v62  ;;  %954 = vmatpush1.bf16.msra.mxu0 %v1578_v63 }
  0x6d   : > { %1007 = vmatpush1.bf16.msra.mxu1 %v1581_v0  ;;  %955 = vmatprep.subr.bf16.mxu0 %v1586_v1 }
  0x6e   : > { %1008 = vmatprep.subr.bf16.mxu1 %v1589_v2  ;;  %979 = vmatprep.mubr.bf16.mxu0 %v1673_v14 }
  0x6f   : > { %1032 = vmatprep.mubr.bf16.mxu1 %v1673_v14 }
  0x70   : > { %956 = vmatpush1.bf16.msra.mxu0 %v1584_v3 }
  0x71   : > { %1009 = vmatpush1.bf16.msra.mxu1 %v1587_v4  ;;  %957 = vmatprep.subr.bf16.mxu0 %v1593_v5 }
  0x72   : > { %1010 = vmatprep.subr.bf16.mxu1 %v1596_v6 }
  0x74   : > { %958 = vmatpush1.bf16.msra.mxu0 %v1591_v7 }
  0x75   : > { %1011 = vmatpush1.bf16.msra.mxu1 %v1594_v8  ;;  %959 = vmatprep.subr.bf16.mxu0 %v1599_v9 }
  0x76   : > { %1012 = vmatprep.subr.bf16.mxu1 %v1602_v10 }
  0x78   : > { %960 = vmatpush1.bf16.msra.mxu0 %v1597_v11 }
  0x79   : > { %1013 = vmatpush1.bf16.msra.mxu1 %v1600_v12  ;;  %961 = vmatprep.subr.bf16.mxu0 %v1605_v13 }
  0x7a   : > { %1014 = vmatprep.subr.bf16.mxu1 %v1608_v15 }
  0x7c   : > { %962 = vmatpush1.bf16.msra.mxu0 %v1603_v18 }
  0x7d   : > { %1015 = vmatpush1.bf16.msra.mxu1 %v1606_v19  ;;  %1488 = vmatprep.subr.msk.bf16.mxu0 %vm804_vm0, %v1473_v20 }
  0x7e   : > { %1491 = vmatprep.subr.msk.bf16.mxu1 %vm804_vm0, %v1475_v21 }
  0x7f   : > { %1483 = vmatmul.mubr.msk.bf16.vlgmr.msra.gmra.mxu0 %vm797_vm1, %v1933_v53 }
  0x80   : > { %1486 = vmatmul.mubr.msk.bf16.vlgmr.msra.gmra.mxu1 %vm797_vm1, %v1933_v53  ;;  %1056 = vmatpush1.bf16.msra.mxu0 %v830_v24 }
  0x81   : > { %1109 = vmatpush1.bf16.msra.mxu1 %v836_v25  ;;  %1057 = vmatprep.subr.bf16.mxu0 %v1615_v26 }
  0x82   : > { %1110 = vmatprep.subr.bf16.mxu1 %v1618_v27  ;;  %989 = vmatprep.mubr.bf16.mxu0 %v1673_v14 }
  0x83   : > { %1042 = vmatprep.mubr.bf16.mxu1 %v1673_v14 }
  0x84   : > { %1058 = vmatpush1.bf16.msra.mxu0 %v1613_v28 }
  0x85   : > { %1111 = vmatpush1.bf16.msra.mxu1 %v1616_v29  ;;  %1059 = vmatprep.subr.bf16.mxu0 %v1621_v30 }
  0x86   : > { %1112 = vmatprep.subr.bf16.mxu1 %v1624_v31 }
  0x87   : > { %1484 = vmatmul.mubr.msk.bf16.gmra.mxu0 %vm797_vm1, %v1954_v62 }
  0x88   : > { %1487 = vmatmul.mubr.msk.bf16.gmra.mxu1 %vm797_vm1, %v1954_v62  ;;  %1060 = vmatpush1.bf16.msra.mxu0 %v1619_v32 }
  0x89   : > { %1113 = vmatpush1.bf16.msra.mxu1 %v1622_v33  ;;  %1061 = vmatprep.subr.bf16.mxu0 %v1627_v34 }
  0x8a   : > { %1114 = vmatprep.subr.bf16.mxu1 %v1630_v35  ;;  %1085 = vmatprep.mubr.bf16.mxu0 %v1673_v14 }
  0x8b   : > { %1138 = vmatprep.mubr.bf16.mxu1 %v1673_v14 }
  0x8c   : > { %1062 = vmatpush1.bf16.msra.mxu0 %v1625_v36 }
  0x8d   : > { %1115 = vmatpush1.bf16.msra.mxu1 %v1628_v37  ;;  %1063 = vmatprep.subr.bf16.mxu0 %v1633_v38 }
  0x8e   : > { %1116 = vmatprep.subr.bf16.mxu1 %v1636_v39 }
  0x90   : > { %1064 = vmatpush1.bf16.msra.mxu0 %v1631_v40 }
  0x91   : > { %1117 = vmatpush1.bf16.msra.mxu1 %v1634_v41  ;;  %1065 = vmatprep.subr.bf16.mxu0 %v1639_v42 }
  0x92   : > { %1118 = vmatprep.subr.bf16.mxu1 %v1642_v43 }
  0x94   : > { %1066 = vmatpush1.bf16.msra.mxu0 %v1637_v44 }
  0x95   : > { %1119 = vmatpush1.bf16.msra.mxu1 %v1640_v45  ;;  %1067 = vmatprep.subr.bf16.mxu0 %v1645_v46 }
  0x96   : > { %1120 = vmatprep.subr.bf16.mxu1 %v1648_v47 }
  0x98   : > { %1068 = vmatpush1.bf16.msra.mxu0 %v1643_v48 }
  0x99   : > { %1121 = vmatpush1.bf16.msra.mxu1 %v1646_v49 }
  0x9b   : > { %1489 = vmatmul.mubr.msk.bf16.vlgmr.msra.gmra.mxu0 %vm797_vm1, %v1933_v53 }
  0x9c   : > { %1492 = vmatmul.mubr.msk.bf16.vlgmr.msra.gmra.mxu1 %vm797_vm1, %v1933_v53  ;;  %1095 = vmatprep.mubr.bf16.mxu0 %v1673_v14 }
  0x9d   : > { %1148 = vmatprep.mubr.bf16.mxu1 %v1673_v14 }
  0xa3   : > { %1490 = vmatmul.mubr.msk.bf16.gmra.mxu0 %vm797_vm1, %v1954_v62 }
  0xa4   : > { %1493 = vmatmul.mubr.msk.bf16.gmra.mxu1 %vm797_vm1, %v1954_v62 }
 0x123   : > { %v875_v50 = vpop.f32.mrf.mxu0 }
 0x124   : > { %v928_v51 = vpop.f32.mrf.mxu1  ;;  %1159 = vst [vmem:[%s2034_s5] sm:$0xff] %v875_v50 }
 0x125   : > { %1161 = vst [vmem:[%s2034_s5 + $0x10] sm:$0xff] %v928_v51  ;;  %v877_v14 = vpop.f32.mrf.mxu0 }
 0x126   : > { %v930_v52 = vpop.f32.mrf.mxu1  ;;  %1160 = vst [vmem:[%s2034_s5 + $0x8] sm:$0xff] %v877_v14 }
 0x127   : > { %1162 = vst [vmem:[%s2034_s5 + $0x18] sm:$0xff] %v930_v52  ;;  %v879_v53 = vpop.f32.mrf.mxu0 }
 0x128   : > { %v932_v54 = vpop.f32.mrf.mxu1  ;;  %1171 = vst [vmem:[%s2034_s5 + $0x60] sm:$0xff] %v879_v53 }
 0x129   : > { %1173 = vst [vmem:[%s2034_s5 + $0x70] sm:$0xff] %v932_v54  ;;  %v881_v55 = vpop.f32.mrf.mxu0 }
 0x12a   : > { %v934_v56 = vpop.f32.mrf.mxu1  ;;  %1172 = vst [vmem:[%s2034_s5 + $0x68] sm:$0xff] %v881_v55 }
 0x12b   : > { %1174 = vst [vmem:[%s2034_s5 + $0x78] sm:$0xff] %v934_v56  ;;  %v885_v57 = vpop.f32.mrf.mxu0  ;;  %v1229_v34 = vld [vmem:[%s2034_s5] sm:$0xff] (%p1719_p5) }
 0x12c   : > { %v938_v58 = vpop.f32.mrf.mxu1  ;;  %1183 = vst [vmem:[%s2034_s5 + $0xc0] sm:$0xff] %v885_v57  ;;  %v1233_v36 = vld [vmem:[%s2034_s5 + $0x10] sm:$0xff] (%p1719_p5)  ;;  %1230 = vst [vmem:[%s2097_s9] sm:$0xff] (%p1719_p5), %v1229_v34 }
 0x12d   : > { %1185 = vst [vmem:[%s2034_s5 + $0xd0] sm:$0xff] %v938_v58  ;;  %v887_v59 = vpop.f32.mrf.mxu0  ;;  %v1231_v35 = vld [vmem:[%s2034_s5 + $0x8] sm:$0xff] (%p1719_p5)  ;;  %1234 = vst [vmem:[%s2097_s9 + $0x10] sm:$0xff] (%p1719_p5), %v1233_v36 }
 0x12e   : > { %v940_v60 = vpop.f32.mrf.mxu1  ;;  %1184 = vst [vmem:[%s2034_s5 + $0xc8] sm:$0xff] %v887_v59  ;;  %v1235_v37 = vld [vmem:[%s2034_s5 + $0x18] sm:$0xff] (%p1719_p5)  ;;  %1232 = vst [vmem:[%s2097_s9 + $0x8] sm:$0xff] (%p1719_p5), %v1231_v35 }
 0x12f   : > { %1186 = vst [vmem:[%s2034_s5 + $0xd8] sm:$0xff] %v940_v60  ;;  %v889_v61 = vpop.f32.mrf.mxu0  ;;  %1236 = vst [vmem:[%s2097_s9 + $0x18] sm:$0xff] (%p1719_p5), %v1235_v37  ;;  %v1253_v46 = vld [vmem:[%s2034_s5 + $0x60] sm:$0xff] (%p1719_p5) }
 0x130   : > { %v942_v62 = vpop.f32.mrf.mxu1  ;;  %1195 = vst [vmem:[%s2034_s5 + $0x120] sm:$0xff] %v889_v61  ;;  %v1257_v48 = vld [vmem:[%s2034_s5 + $0x70] sm:$0xff] (%p1719_p5)  ;;  %1254 = vst [vmem:[%s2097_s9 + $0xc0] sm:$0xff] (%p1719_p5), %v1253_v46 }
 0x131   : > { %1197 = vst [vmem:[%s2034_s5 + $0x130] sm:$0xff] %v942_v62  ;;  %v891_v63 = vpop.f32.mrf.mxu0  ;;  %v1255_v47 = vld [vmem:[%s2034_s5 + $0x68] sm:$0xff] (%p1719_p5)  ;;  %1258 = vst [vmem:[%s2097_s9 + $0xd0] sm:$0xff] (%p1719_p5), %v1257_v48 }
 0x132   : > { %v944_v0 = vpop.f32.mrf.mxu1  ;;  %1196 = vst [vmem:[%s2034_s5 + $0x128] sm:$0xff] %v891_v63  ;;  %1256 = vst [vmem:[%s2097_s9 + $0xc8] sm:$0xff] (%p1719_p5), %v1255_v47  ;;  %v1259_v49 = vld [vmem:[%s2034_s5 + $0x78] sm:$0xff] (%p1719_p5) }
 0x133   : > { %1198 = vst [vmem:[%s2034_s5 + $0x138] sm:$0xff] %v944_v0  ;;  %1260 = vst [vmem:[%s2097_s9 + $0xd8] sm:$0xff] (%p1719_p5), %v1259_v49  ;;  %v1277_v57 = vld [vmem:[%s2034_s5 + $0xc0] sm:$0xff] (%p1719_p5) }
 0x134   : > { %v1281_v59 = vld [vmem:[%s2034_s5 + $0xd0] sm:$0xff] (%p1719_p5)  ;;  %1278 = vst [vmem:[%s2097_s9 + $0x180] sm:$0xff] (%p1719_p5), %v1277_v57 }
 0x135   : > { %v1279_v58 = vld [vmem:[%s2034_s5 + $0xc8] sm:$0xff] (%p1719_p5)  ;;  %1282 = vst [vmem:[%s2097_s9 + $0x190] sm:$0xff] (%p1719_p5), %v1281_v59 }
 0x136   : > { %1280 = vst [vmem:[%s2097_s9 + $0x188] sm:$0xff] (%p1719_p5), %v1279_v58  ;;  %v1283_v60 = vld [vmem:[%s2034_s5 + $0xd8] sm:$0xff] (%p1719_p5) }
 0x137   : > { %1284 = vst [vmem:[%s2097_s9 + $0x198] sm:$0xff] (%p1719_p5), %v1283_v60 }
 0x13f   : > { %v981_v1 = vpop.f32.mrf.mxu0 }
 0x140   : > { %v1034_v2 = vpop.f32.mrf.mxu1  ;;  %1163 = vst [vmem:[%s2034_s5 + $0x20] sm:$0xff] %v981_v1 }
 0x141   : > { %1165 = vst [vmem:[%s2034_s5 + $0x30] sm:$0xff] %v1034_v2  ;;  %v983_v3 = vpop.f32.mrf.mxu0 }
 0x142   : > { %v1036_v4 = vpop.f32.mrf.mxu1  ;;  %1164 = vst [vmem:[%s2034_s5 + $0x28] sm:$0xff] %v983_v3 }
 0x143   : > { %1166 = vst [vmem:[%s2034_s5 + $0x38] sm:$0xff] %v1036_v4  ;;  %v985_v5 = vpop.f32.mrf.mxu0 }
 0x144   : > { %v1038_v6 = vpop.f32.mrf.mxu1  ;;  %1175 = vst [vmem:[%s2034_s5 + $0x80] sm:$0xff] %v985_v5  ;;  %v1301_v5 = vld [vmem:[%s2034_s5 + $0x120] sm:$0xff] (%p1719_p5) }
 0x145   : > { %1177 = vst [vmem:[%s2034_s5 + $0x90] sm:$0xff] %v1038_v6  ;;  %v987_v7 = vpop.f32.mrf.mxu0  ;;  %v1303_v6 = vld [vmem:[%s2034_s5 + $0x128] sm:$0xff] (%p1719_p5)  ;;  %1302 = vst [vmem:[%s2097_s9 + $0x240] sm:$0xff] (%p1719_p5), %v1301_v5 }
 0x146   : > { %v1040_v8 = vpop.f32.mrf.mxu1  ;;  %1176 = vst [vmem:[%s2034_s5 + $0x88] sm:$0xff] %v987_v7  ;;  %v1305_v7 = vld [vmem:[%s2034_s5 + $0x130] sm:$0xff] (%p1719_p5)  ;;  %1304 = vst [vmem:[%s2097_s9 + $0x248] sm:$0xff] (%p1719_p5), %v1303_v6 }
 0x147   : > { %1178 = vst [vmem:[%s2034_s5 + $0x98] sm:$0xff] %v1040_v8  ;;  %v991_v9 = vpop.f32.mrf.mxu0  ;;  %v1237_v38 = vld [vmem:[%s2034_s5 + $0x20] sm:$0xff] (%p1719_p5)  ;;  %1306 = vst [vmem:[%s2097_s9 + $0x250] sm:$0xff] (%p1719_p5), %v1305_v7  ;;  %v1307_v8 = vld [vmem:[%s2034_s5 + $0x138] sm:$0xff] (%p1719_p5) }
 0x148   : > { %v1044_v10 = vpop.f32.mrf.mxu1  ;;  %1187 = vst [vmem:[%s2034_s5 + $0xe0] sm:$0xff] %v991_v9  ;;  %v1241_v40 = vld [vmem:[%s2034_s5 + $0x30] sm:$0xff] (%p1719_p5)  ;;  %1238 = vst [vmem:[%s2097_s9 + $0x20] sm:$0xff] (%p1719_p5), %v1237_v38 }
 0x149   : > { %1189 = vst [vmem:[%s2034_s5 + $0xf0] sm:$0xff] %v1044_v10  ;;  %v993_v11 = vpop.f32.mrf.mxu0  ;;  %v1239_v39 = vld [vmem:[%s2034_s5 + $0x28] sm:$0xff] (%p1719_p5)  ;;  %1242 = vst [vmem:[%s2097_s9 + $0x30] sm:$0xff] (%p1719_p5), %v1241_v40 }
 0x14a   : > { %v1046_v12 = vpop.f32.mrf.mxu1  ;;  %1188 = vst [vmem:[%s2034_s5 + $0xe8] sm:$0xff] %v993_v11  ;;  %v1243_v41 = vld [vmem:[%s2034_s5 + $0x38] sm:$0xff] (%p1719_p5)  ;;  %1240 = vst [vmem:[%s2097_s9 + $0x28] sm:$0xff] (%p1719_p5), %v1239_v39 }
 0x14b   : > { %1190 = vst [vmem:[%s2034_s5 + $0xf8] sm:$0xff] %v1046_v12  ;;  %v995_v13 = vpop.f32.mrf.mxu0  ;;  %1244 = vst [vmem:[%s2097_s9 + $0x38] sm:$0xff] (%p1719_p5), %v1243_v41  ;;  %v1261_v50 = vld [vmem:[%s2034_s5 + $0x80] sm:$0xff] (%p1719_p5) }
 0x14c   : > { %v1048_v15 = vpop.f32.mrf.mxu1  ;;  %1199 = vst [vmem:[%s2034_s5 + $0x140] sm:$0xff] %v995_v13  ;;  %1262 = vst [vmem:[%s2097_s9 + $0xe0] sm:$0xff] (%p1719_p5), %v1261_v50  ;;  %v1265_v14 = vld [vmem:[%s2034_s5 + $0x90] sm:$0xff] (%p1719_p5) }
 0x14d   : > { %1201 = vst [vmem:[%s2034_s5 + $0x150] sm:$0xff] %v1048_v15  ;;  %v997_v16 = vpop.f32.mrf.mxu0  ;;  %v1263_v51 = vld [vmem:[%s2034_s5 + $0x88] sm:$0xff] (%p1719_p5)  ;;  %1266 = vst [vmem:[%s2097_s9 + $0xf0] sm:$0xff] (%p1719_p5), %v1265_v14 }
 0x14e   : > { %v1050_v17 = vpop.f32.mrf.mxu1  ;;  %1200 = vst [vmem:[%s2034_s5 + $0x148] sm:$0xff] %v997_v16  ;;  %1264 = vst [vmem:[%s2097_s9 + $0xe8] sm:$0xff] (%p1719_p5), %v1263_v51  ;;  %v1267_v52 = vld [vmem:[%s2034_s5 + $0x98] sm:$0xff] (%p1719_p5) }
 0x14f   : > { %1202 = vst [vmem:[%s2034_s5 + $0x158] sm:$0xff] %v1050_v17  ;;  %1268 = vst [vmem:[%s2097_s9 + $0xf8] sm:$0xff] (%p1719_p5), %v1267_v52  ;;  %v1285_v61 = vld [vmem:[%s2034_s5 + $0xe0] sm:$0xff] (%p1719_p5) }
 0x150   : > { %1286 = vst [vmem:[%s2097_s9 + $0x1a0] sm:$0xff] (%p1719_p5), %v1285_v61  ;;  %v1289_v63 = vld [vmem:[%s2034_s5 + $0xf0] sm:$0xff] (%p1719_p5)  ;;  %1308 = vst [vmem:[%s2097_s9 + $0x258] sm:$0xff] (%p1719_p5), %v1307_v8 }
 0x151   : > { %v1287_v62 = vld [vmem:[%s2034_s5 + $0xe8] sm:$0xff] (%p1719_p5)  ;;  %1290 = vst [vmem:[%s2097_s9 + $0x1b0] sm:$0xff] (%p1719_p5), %v1289_v63 }
 0x152   : > { %1288 = vst [vmem:[%s2097_s9 + $0x1a8] sm:$0xff] (%p1719_p5), %v1287_v62  ;;  %v1291_v0 = vld [vmem:[%s2034_s5 + $0xf8] sm:$0xff] (%p1719_p5) }
 0x153   : > { %1292 = vst [vmem:[%s2097_s9 + $0x1b8] sm:$0xff] (%p1719_p5), %v1291_v0  ;;  %v1309_v9 = vld [vmem:[%s2034_s5 + $0x140] sm:$0xff] (%p1719_p5) }
 0x154   : > { %1310 = vst [vmem:[%s2097_s9 + $0x260] sm:$0xff] (%p1719_p5), %v1309_v9  ;;  %v1313_v11 = vld [vmem:[%s2034_s5 + $0x150] sm:$0xff] (%p1719_p5) }
 0x155   : > { %v1311_v10 = vld [vmem:[%s2034_s5 + $0x148] sm:$0xff] (%p1719_p5)  ;;  %1314 = vst [vmem:[%s2097_s9 + $0x270] sm:$0xff] (%p1719_p5), %v1313_v11 }
 0x156   : > { %1312 = vst [vmem:[%s2097_s9 + $0x268] sm:$0xff] (%p1719_p5), %v1311_v10  ;;  %v1315_v12 = vld [vmem:[%s2034_s5 + $0x158] sm:$0xff] (%p1719_p5) }
 0x157   : > { %1316 = vst [vmem:[%s2097_s9 + $0x278] sm:$0xff] (%p1719_p5), %v1315_v12 }
 0x15b   : > { %v1087_v18 = vpop.f32.mrf.mxu0 }
 0x15c   : > { %v1140_v19 = vpop.f32.mrf.mxu1  ;;  %1167 = vst [vmem:[%s2034_s5 + $0x40] sm:$0xff] %v1087_v18 }
 0x15d   : > { %1169 = vst [vmem:[%s2034_s5 + $0x50] sm:$0xff] %v1140_v19  ;;  %v1089_v20 = vpop.f32.mrf.mxu0 }
 0x15e   : > { %v1142_v21 = vpop.f32.mrf.mxu1  ;;  %1168 = vst [vmem:[%s2034_s5 + $0x48] sm:$0xff] %v1089_v20 }
 0x15f   : > { %1170 = vst [vmem:[%s2034_s5 + $0x58] sm:$0xff] %v1142_v21  ;;  %v1091_v22 = vpop.f32.mrf.mxu0 }
 0x160   : > { %v1144_v23 = vpop.f32.mrf.mxu1  ;;  %1179 = vst [vmem:[%s2034_s5 + $0xa0] sm:$0xff] %v1091_v22 }
 0x161   : > { %1181 = vst [vmem:[%s2034_s5 + $0xb0] sm:$0xff] %v1144_v23  ;;  %v1093_v24 = vpop.f32.mrf.mxu0 }
 0x162   : > { %v1146_v25 = vpop.f32.mrf.mxu1  ;;  %1180 = vst [vmem:[%s2034_s5 + $0xa8] sm:$0xff] %v1093_v24 }
 0x163   : > { %1182 = vst [vmem:[%s2034_s5 + $0xb8] sm:$0xff] %v1146_v25  ;;  %v1097_v26 = vpop.f32.mrf.mxu0  ;;  %v1245_v42 = vld [vmem:[%s2034_s5 + $0x40] sm:$0xff] (%p1719_p5) }
 0x164   : > { %v1150_v27 = vpop.f32.mrf.mxu1  ;;  %1191 = vst [vmem:[%s2034_s5 + $0x100] sm:$0xff] %v1097_v26  ;;  %1246 = vst [vmem:[%s2097_s9 + $0x40] sm:$0xff] (%p1719_p5), %v1245_v42  ;;  %v1249_v44 = vld [vmem:[%s2034_s5 + $0x50] sm:$0xff] (%p1719_p5) }
 0x165   : > { %1193 = vst [vmem:[%s2034_s5 + $0x110] sm:$0xff] %v1150_v27  ;;  %v1099_v28 = vpop.f32.mrf.mxu0  ;;  %v1247_v43 = vld [vmem:[%s2034_s5 + $0x48] sm:$0xff] (%p1719_p5)  ;;  %1250 = vst [vmem:[%s2097_s9 + $0x50] sm:$0xff] (%p1719_p5), %v1249_v44 }
 0x166   : > { %v1152_v29 = vpop.f32.mrf.mxu1  ;;  %1192 = vst [vmem:[%s2034_s5 + $0x108] sm:$0xff] %v1099_v28  ;;  %v1251_v45 = vld [vmem:[%s2034_s5 + $0x58] sm:$0xff] (%p1719_p5)  ;;  %1248 = vst [vmem:[%s2097_s9 + $0x48] sm:$0xff] (%p1719_p5), %v1247_v43 }
 0x167   : > { %1194 = vst [vmem:[%s2034_s5 + $0x118] sm:$0xff] %v1152_v29  ;;  %v1101_v30 = vpop.f32.mrf.mxu0  ;;  %1213 = sbr.rel (!%p1719_p5) target bundleno = 372 (0x174), region = 55  ;;  %1252 = vst [vmem:[%s2097_s9 + $0x58] sm:$0xff] (%p1719_p5), %v1251_v45  ;;  %v1269_v53 = vld [vmem:[%s2034_s5 + $0xa0] sm:$0xff] (%p1719_p5) }
 0x168   : > { %v1154_v31 = vpop.f32.mrf.mxu1  ;;  %1203 = vst [vmem:[%s2034_s5 + $0x160] sm:$0xff] %v1101_v30  ;;  %1270 = vst [vmem:[%s2097_s9 + $0x100] sm:$0xff] (%p1719_p5), %v1269_v53  ;;  %v1273_v55 = vld [vmem:[%s2034_s5 + $0xb0] sm:$0xff] (%p1719_p5) }
 0x169   : > { %1205 = vst [vmem:[%s2034_s5 + $0x170] sm:$0xff] %v1154_v31  ;;  %v1103_v32 = vpop.f32.mrf.mxu0  ;;  %v1271_v54 = vld [vmem:[%s2034_s5 + $0xa8] sm:$0xff] (%p1719_p5)  ;;  %1274 = vst [vmem:[%s2097_s9 + $0x110] sm:$0xff] (%p1719_p5), %v1273_v55 }
 0x16a   : > { %v1156_v33 = vpop.f32.mrf.mxu1  ;;  %1204 = vst [vmem:[%s2034_s5 + $0x168] sm:$0xff] %v1103_v32  ;;  %v1275_v56 = vld [vmem:[%s2034_s5 + $0xb8] sm:$0xff] (%p1719_p5)  ;;  %1272 = vst [vmem:[%s2097_s9 + $0x108] sm:$0xff] (%p1719_p5), %v1271_v54 }
 0x16b   : > { %1206 = vst [vmem:[%s2034_s5 + $0x178] sm:$0xff] %v1156_v33  ;;  %1276 = vst [vmem:[%s2097_s9 + $0x118] sm:$0xff] (%p1719_p5), %v1275_v56  ;;  %v1293_v1 = vld [vmem:[%s2034_s5 + $0x100] sm:$0xff] (%p1719_p5) }
 0x16c   : > { %1294 = vst [vmem:[%s2097_s9 + $0x1c0] sm:$0xff] %v1293_v1  ;;  %v1297_v3 = vld [vmem:[%s2034_s5 + $0x110] sm:$0xff] }
 0x16d   : > { %v1295_v2 = vld [vmem:[%s2034_s5 + $0x108] sm:$0xff]  ;;  %1298 = vst [vmem:[%s2097_s9 + $0x1d0] sm:$0xff] %v1297_v3 }
 0x16e   : > { %v1299_v4 = vld [vmem:[%s2034_s5 + $0x118] sm:$0xff]  ;;  %1296 = vst [vmem:[%s2097_s9 + $0x1c8] sm:$0xff] %v1295_v2 }
 0x16f   : > { %1300 = vst [vmem:[%s2097_s9 + $0x1d8] sm:$0xff] %v1299_v4  ;;  %v1317_v13 = vld [vmem:[%s2034_s5 + $0x160] sm:$0xff] }
 0x170   : > { %1318 = vst [vmem:[%s2097_s9 + $0x280] sm:$0xff] %v1317_v13  ;;  %v1321_v16 = vld [vmem:[%s2034_s5 + $0x170] sm:$0xff] }
 0x171   : > { %v1319_v15 = vld [vmem:[%s2034_s5 + $0x168] sm:$0xff]  ;;  %1322 = vst [vmem:[%s2097_s9 + $0x290] sm:$0xff] %v1321_v16 }
 0x172   : > { %v1323_v17 = vld [vmem:[%s2034_s5 + $0x178] sm:$0xff]  ;;  %1320 = vst [vmem:[%s2097_s9 + $0x288] sm:$0xff] %v1319_v15 }
 0x173   : > { %1324 = vst [vmem:[%s2097_s9 + $0x298] sm:$0xff] %v1323_v17 }
 0x174 PF: > { %p9_p10 = scmp.ge.s32.totalorder %s1706_s13, 4   ;;  %s2203_s9 = smov %s1667_s10 }
 0x175   : > { %s2204_s10 = smov %s1717_s16  ;;  %s2205_s11 = smov %s1706_s13 }
 0x176   :  { %11 = sbr.rel (!%p9_p10) target bundleno = 2 (0x2), region = 109 }

</bundles_post_ra>
